<compile_context>
chip_gen: v5e
topology: v5e:2x2
jax: 0.10.0
libtpu: 0.0.40
codegen_flags: <defaults>
</compile_context>

<pallas_src>
import functools

import jax
import jax.numpy as jnp
from jax.experimental import pallas as pl
from jax.experimental.pallas import tpu as pltpu


def _round_up(v, m):
    return (v + m - 1) // m * m


def output_kernel(slope_ref, x_ref, state_ref, tile_ref, seg_ref, hfold_ref, rt_ref,
                  y_ref, *, embed_size):
    E = embed_size
    x = x_ref[...]                                                      # [bb, E]
    s = state_ref[...]                                                  # [bb, K*E]

    # Broadcast the query across the K lane blocks on the (idle) MXU.
    xt = jnp.dot(x, tile_ref[...], preferred_element_type=jnp.float32)  # [bb, K*E]

    # Attention logits: per-block segment sums, broadcast back across each
    # block's 32 lanes via a constant block-indicator matmul (full-lane vregs).
    prod = s * xt
    logits = jnp.dot(prod, seg_ref[...], preferred_element_type=jnp.float32)  # [bb, K*E]

    # Stabilized softmax over the K blocks.  Each block's logit is repeated E
    # times along the lanes, so the full-lane sum equals E * sum_k exp_k;
    # exact divide (not the bottleneck).
    m = jnp.max(logits, axis=1, keepdims=True)
    e = jnp.exp(logits - m)
    p = e * (float(E) / jnp.sum(e, axis=1, keepdims=True))              # [bb, K*E]

    # u = sum_k p_k * state_k; the fold over blocks is fused with H^T into one
    # constant [K*E, E] matmul:  h = H(u).
    h = jnp.dot(p * s, hfold_ref[...], preferred_element_type=jnp.float32)    # [bb, E]

    # PReLU(slope); slope == 0 -> ReLU.
    z = x + h
    slope = slope_ref[0]
    a = jnp.maximum(z, 0.0) + slope * jnp.minimum(z, 0.0)

    # y = R(a); narrow (readout-wide) store writes only the useful bytes.
    y_ref[...] = jnp.dot(a, rt_ref[...], preferred_element_type=jnp.float32).astype(y_ref.dtype)


def output_module_forward(x, state, H_w, R_w, num_blocks, embed_size,
                          prelu_slope=0.0, *, block_b=1024):
    """x: [B, 1, E]; state: [B, K*E]; H_w: [E, E] (torch [out,in]);
    R_w: [readout, E] (torch [out,in]).  Returns y: [B, readout] float32."""
    B = x.shape[0]
    K, E = num_blocks, embed_size
    readout = R_w.shape[0]
    assert state.shape == (B, K * E)
    assert x.shape[-1] == E and H_w.shape == (E, E) and R_w.shape[1] == E

    q = x.reshape(B, E).astype(jnp.float32)
    s = state.astype(jnp.float32)

    # Grid-invariant constants (DMA'd once, VMEM-resident across grid steps).
    eye = jnp.eye(E, dtype=jnp.float32)
    tile_mat = jnp.tile(eye, (1, K))                                 # [E, K*E] query broadcast
    blk = jnp.arange(K * E, dtype=jnp.int32) // E
    seg_mat = (blk[:, None] == blk[None, :]).astype(jnp.float32)     # [K*E, K*E] block indicator
    h_fold = jnp.tile(H_w.T.astype(jnp.float32), (K, 1))             # [K*E, E] block-fold fused with H^T
    r_t = R_w.T.astype(jnp.float32)                                  # [E, readout]
    slope = jnp.asarray([prelu_slope], dtype=jnp.float32)

    # Batch tile: big enough to amortize per-step overhead, capped so the grid
    # has >=2 steps when possible (v7x megacore), 8-row sublane aligned, and
    # never larger than the array (tiny-B path uses the full-extent exception).
    bb = min(block_b, _round_up(pl.cdiv(B, 2), 8))
    bb = max(bb, 8)
    bb = min(bb, B)
    grid = (pl.cdiv(B, bb),)

    kernel = functools.partial(output_kernel, embed_size=E)

    out = pl.pallas_call(
        kernel,
        out_shape=jax.ShapeDtypeStruct((B, readout), jnp.float32),
        grid=grid,
        in_specs=[
            pl.BlockSpec(memory_space=pltpu.MemorySpace.SMEM),        # PReLU slope scalar
            pl.BlockSpec((bb, E), lambda i: (i, 0)),                  # query block
            pl.BlockSpec((bb, K * E), lambda i: (i, 0)),              # state block (fused lane-dense)
            pl.BlockSpec((E, K * E), lambda i: (0, 0)),               # tile_mat (VMEM-resident)
            pl.BlockSpec((K * E, K * E), lambda i: (0, 0)),           # seg_mat  (VMEM-resident)
            pl.BlockSpec((K * E, E), lambda i: (0, 0)),               # h_fold   (VMEM-resident)
            pl.BlockSpec((E, readout), lambda i: (0, 0)),             # r_t      (VMEM-resident)
        ],
        out_specs=pl.BlockSpec((bb, readout), lambda i: (i, 0)),
        compiler_params=pltpu.CompilerParams(
            dimension_semantics=("parallel",),                        # shard batch grid across TCs
        ),
    )(slope, q, s, tile_mat, seg_mat, h_fold, r_t)

    return out


def reference_forward(x, state, H_w, R_w, num_blocks, embed_size, prelu_slope):
    B = x.shape[0]
    q = x.reshape(B, embed_size)
    s = state.reshape(B, num_blocks, embed_size)
    att = jnp.sum(s * q[:, None, :], axis=2)
    att = jax.nn.softmax(att, axis=-1)
    u = jnp.sum(s * att[:, :, None], axis=1)
    z = q + jnp.dot(u, H_w.T, precision=jax.lax.Precision.HIGHEST)
    a = jnp.maximum(z, 0.0) + prelu_slope * jnp.minimum(z, 0.0)
    return jnp.dot(a, R_w.T, precision=jax.lax.Precision.HIGHEST)


if __name__ == "__main__":
    B = 2
    num_blocks = 4
    embed_size = 32
    readout_size = 16
    prelu_slope = 0.25   # PyTorch nn.PReLU default init; use 0.0 for plain ReLU

    key = jax.random.PRNGKey(0)
    k1, k2, k3, k4 = jax.random.split(key, 4)

    x = jax.random.normal(k1, (B, 1, embed_size), dtype=jnp.float32)
    state = jax.random.normal(k2, (B, num_blocks * embed_size), dtype=jnp.float32)
    # weight init: normal(0, 0.1), torch Linear layout [out_features, in_features]
    H_w = 0.1 * jax.random.normal(k3, (embed_size, embed_size), dtype=jnp.float32)
    R_w = 0.1 * jax.random.normal(k4, (readout_size, embed_size), dtype=jnp.float32)

    y = output_module_forward(x, state, H_w, R_w, num_blocks, embed_size, prelu_slope)
    y = jax.block_until_ready(y)

    y_ref = reference_forward(x, state, H_w, R_w, num_blocks, embed_size, prelu_slope)
    assert y.shape == (B, readout_size)
    err = float(jnp.max(jnp.abs(y - y_ref)))
    # Exact softmax divide now; slack only covers MXU f32 multi-pass rounding.
    assert jnp.allclose(y, y_ref, atol=2e-3, rtol=2e-3), err

    print("KERNEL_OK")
</pallas_src>

<mosaic_0001>
module attributes {stable_mosaic.version = 11 : i64} {
  func.func @output_kernel(%arg0: i32, %arg1: memref<1xf32, #tpu.memory_space<smem>>, %arg2: memref<2x32xf32, #tpu.memory_space<vmem>>, %arg3: memref<2x128xf32, #tpu.memory_space<vmem>>, %arg4: memref<32x128xf32, #tpu.memory_space<vmem>>, %arg5: memref<128x128xf32, #tpu.memory_space<vmem>>, %arg6: memref<128x32xf32, #tpu.memory_space<vmem>>, %arg7: memref<32x16xf32, #tpu.memory_space<vmem>>, %arg8: memref<2x16xf32, #tpu.memory_space<vmem>>) attributes {dimension_semantics = [#tpu.dimension_semantics<parallel>], iteration_bounds = array<i64: 1>, scalar_prefetch = 0 : i64, scratch_operands = 0 : i64, tpu.core_type = #tpu.core_type<tc>, window_params = [{transform_indices = @transform_0, window_bounds = array<i64: 1>}, {transform_indices = @transform_1, window_bounds = array<i64: 2, 32>}, {transform_indices = @transform_2, window_bounds = array<i64: 2, 128>}, {pipeline_mode = #tpu.pipeline_mode<synchronous>, transform_indices = @transform_3, window_bounds = array<i64: 32, 128>}, {pipeline_mode = #tpu.pipeline_mode<synchronous>, transform_indices = @transform_4, window_bounds = array<i64: 128, 128>}, {pipeline_mode = #tpu.pipeline_mode<synchronous>, transform_indices = @transform_5, window_bounds = array<i64: 128, 32>}, {pipeline_mode = #tpu.pipeline_mode<synchronous>, transform_indices = @transform_6, window_bounds = array<i64: 32, 16>}, {transform_indices = @transform_7, window_bounds = array<i64: 2, 16>}]} {
    %c0 = arith.constant 0 : index
    %c0_0 = arith.constant 0 : index
    %0 = vector.load %arg2[%c0, %c0_0] : memref<2x32xf32, #tpu.memory_space<vmem>>, vector<2x32xf32>
    %c0_1 = arith.constant 0 : index
    %c0_2 = arith.constant 0 : index
    %1 = vector.load %arg3[%c0_1, %c0_2] : memref<2x128xf32, #tpu.memory_space<vmem>>, vector<2x128xf32>
    %c0_3 = arith.constant 0 : index
    %c0_4 = arith.constant 0 : index
    %2 = vector.load %arg4[%c0_3, %c0_4] : memref<32x128xf32, #tpu.memory_space<vmem>>, vector<32x128xf32>
    %cst = arith.constant dense<0.000000e+00> : vector<2x128xf32>
    %3 = tpu.matmul %0, %2, %cst {dimension_numbers = #tpu.dot_dimension_numbers<[1], [0], [0], [1], [0, 0, 1, 1], [], []>} : vector<2x32xf32>, vector<32x128xf32>, vector<2x128xf32> -> vector<2x128xf32>
    %4 = arith.mulf %1, %3 : vector<2x128xf32>
    %c0_5 = arith.constant 0 : index
    %c0_6 = arith.constant 0 : index
    %5 = vector.load %arg5[%c0_5, %c0_6] : memref<128x128xf32, #tpu.memory_space<vmem>>, vector<128x128xf32>
    %cst_7 = arith.constant dense<0.000000e+00> : vector<2x128xf32>
    %6 = tpu.matmul %4, %5, %cst_7 {dimension_numbers = #tpu.dot_dimension_numbers<[1], [0], [0], [1], [0, 0, 1, 1], [], []>} : vector<2x128xf32>, vector<128x128xf32>, vector<2x128xf32> -> vector<2x128xf32>
    %cst_8 = arith.constant dense<0xFF800000> : vector<2xf32>
    %7 = vector.multi_reduction <maximumf>, %6, %cst_8 [1] : vector<2x128xf32> to vector<2xf32>
    %8 = vector.shape_cast %7 : vector<2xf32> to vector<2x1xf32>
    %9 = vector.broadcast %8 : vector<2x1xf32> to vector<2x128xf32>
    %10 = arith.subf %6, %9 : vector<2x128xf32>
    %11 = math.exp %10 : vector<2x128xf32>
    %cst_9 = arith.constant dense<0.000000e+00> : vector<2xf32>
    %12 = vector.multi_reduction <add>, %11, %cst_9 [1] : vector<2x128xf32> to vector<2xf32>
    %13 = vector.shape_cast %12 : vector<2xf32> to vector<2x1xf32>
    %cst_10 = arith.constant 3.200000e+01 : f32
    %14 = vector.broadcast %cst_10 : f32 to vector<2x1xf32>
    %15 = arith.divf %14, %13 : vector<2x1xf32>
    %16 = vector.broadcast %15 : vector<2x1xf32> to vector<2x128xf32>
    %17 = arith.mulf %11, %16 : vector<2x128xf32>
    %18 = arith.mulf %17, %1 : vector<2x128xf32>
    %c0_11 = arith.constant 0 : index
    %c0_12 = arith.constant 0 : index
    %19 = vector.load %arg6[%c0_11, %c0_12] : memref<128x32xf32, #tpu.memory_space<vmem>>, vector<128x32xf32>
    %cst_13 = arith.constant dense<0.000000e+00> : vector<2x32xf32>
    %20 = tpu.matmul %18, %19, %cst_13 {dimension_numbers = #tpu.dot_dimension_numbers<[1], [0], [0], [1], [0, 0, 1, 1], [], []>} : vector<2x128xf32>, vector<128x32xf32>, vector<2x32xf32> -> vector<2x32xf32>
    %21 = arith.addf %0, %20 : vector<2x32xf32>
    %c0_14 = arith.constant 0 : index
    %22 = memref.load %arg1[%c0_14] : memref<1xf32, #tpu.memory_space<smem>>
    %cst_15 = arith.constant 0.000000e+00 : f32
    %23 = vector.broadcast %cst_15 : f32 to vector<2x32xf32>
    %24 = arith.maximumf %21, %23 : vector<2x32xf32>
    %cst_16 = arith.constant 0.000000e+00 : f32
    %25 = vector.broadcast %cst_16 : f32 to vector<2x32xf32>
    %26 = arith.minimumf %21, %25 : vector<2x32xf32>
    %27 = vector.broadcast %22 : f32 to vector<2x32xf32>
    %28 = arith.mulf %27, %26 : vector<2x32xf32>
    %29 = arith.addf %24, %28 : vector<2x32xf32>
    %c0_17 = arith.constant 0 : index
    %c0_18 = arith.constant 0 : index
    %30 = vector.load %arg7[%c0_17, %c0_18] : memref<32x16xf32, #tpu.memory_space<vmem>>, vector<32x16xf32>
    %cst_19 = arith.constant dense<0.000000e+00> : vector<2x16xf32>
    %31 = tpu.matmul %29, %30, %cst_19 {dimension_numbers = #tpu.dot_dimension_numbers<[1], [0], [0], [1], [0, 0, 1, 1], [], []>} : vector<2x32xf32>, vector<32x16xf32>, vector<2x16xf32> -> vector<2x16xf32>
    %c0_20 = arith.constant 0 : index
    %c0_21 = arith.constant 0 : index
    %32 = vector.load %arg8[%c0_20, %c0_21] : memref<2x16xf32, #tpu.memory_space<vmem>>, vector<2x16xf32>
    tpu.vector_store %arg8[%c0_20, %c0_21], %31 {strides = array<i32>} : memref<2x16xf32, #tpu.memory_space<vmem>>, vector<2x16xf32>,
    return
  }
  func.func @transform_0(%arg0: i32) -> i32 {
    %c0_i32 = arith.constant 0 : i32
    %c0_i32_0 = arith.constant 0 : i32
    return %c0_i32 : i32
  }
  func.func @transform_1(%arg0: i32) -> (i32, i32) {
    %c0_i32 = arith.constant 0 : i32
    %c0_i32_0 = arith.constant 0 : i32
    return %arg0, %c0_i32 : i32, i32
  }
  func.func @transform_2(%arg0: i32) -> (i32, i32) {
    %c0_i32 = arith.constant 0 : i32
    %c0_i32_0 = arith.constant 0 : i32
    return %arg0, %c0_i32 : i32, i32
  }
  func.func @transform_3(%arg0: i32) -> (i32, i32) {
    %c0_i32 = arith.constant 0 : i32
    %c0_i32_0 = arith.constant 0 : i32
    %c0_i32_1 = arith.constant 0 : i32
    return %c0_i32, %c0_i32_0 : i32, i32
  }
  func.func @transform_4(%arg0: i32) -> (i32, i32) {
    %c0_i32 = arith.constant 0 : i32
    %c0_i32_0 = arith.constant 0 : i32
    %c0_i32_1 = arith.constant 0 : i32
    return %c0_i32, %c0_i32_0 : i32, i32
  }
  func.func @transform_5(%arg0: i32) -> (i32, i32) {
    %c0_i32 = arith.constant 0 : i32
    %c0_i32_0 = arith.constant 0 : i32
    %c0_i32_1 = arith.constant 0 : i32
    return %c0_i32, %c0_i32_0 : i32, i32
  }
  func.func @transform_6(%arg0: i32) -> (i32, i32) {
    %c0_i32 = arith.constant 0 : i32
    %c0_i32_0 = arith.constant 0 : i32
    %c0_i32_1 = arith.constant 0 : i32
    return %c0_i32, %c0_i32_0 : i32, i32
  }
  func.func @transform_7(%arg0: i32) -> (i32, i32) {
    %c0_i32 = arith.constant 0 : i32
    %c0_i32_0 = arith.constant 0 : i32
    return %arg0, %c0_i32 : i32, i32
  }
}

</mosaic_0001>

<bundles_post_ra>
// kernel: tpu_custom_call.1
= control target key start
LH: loop header
LB: loop body
LE: loop exit
PB: predicated region body
PF: predicated region fallthrough
CT: control target
= control target key end

     0   :  { %vm34_vm0 = vcmask 261120   ;;  %s428_s0 = inlined_call_operand.<no memory space> [shape: f32[1], index: 0, kind: input, shape index: {}]   ;;  %s429_s1 = inlined_call_operand.vmem [shape: f32[2,32], index: 1, kind: input, shape index: {}]   ;;  %s430_s2 = inlined_call_operand.vmem [shape: f32[2,128], index: 2, kind: input, shape index: {}]   ;;  %s431_s3 = inlined_call_operand.vmem [shape: f32[32,128], index: 3, kind: input, shape index: {}]   ;;  %s432_s4 = inlined_call_operand.vmem [shape: f32[128,128], index: 4, kind: input, shape index: {}]   ;;  %s433_s5 = inlined_call_operand.vmem [shape: f32[128,32], index: 5, kind: input, shape index: {}]   ;;  %s434_s6 = inlined_call_operand.vmem [shape: f32[32,16], index: 6, kind: input, shape index: {}]   ;;  %s435_s7 = inlined_call_operand.hbm [shape: f32[2,16], index: 7, kind: output, shape index: {}]  }
   0x1   :  { %v33_v0 = vld [vmem:[%s431_s3 + $0x18] sm:$0xff]  ;;  %v32_v1 = vld [vmem:[%s431_s3 + $0x10] sm:$0xff]  ;;  %v31_v3 = vld [vmem:[%s431_s3 + $0x8] sm:$0xff] }
   0x2   :  { %50 = vmatpush.msra.mxu0 %v33_v0  ;;  %v74_v2 = vld [vmem:[%s432_s4 + $0x78] sm:$0xff]  ;;  %v73_v4 = vld [vmem:[%s432_s4 + $0x70] sm:$0xff]  ;;  %v72_v5 = vld [vmem:[%s432_s4 + $0x68] sm:$0xff] }
   0x3   :  { %75 = vmatpush.msra.mxu1 %v74_v2  ;;  %v30_v6 = vld [vmem:[%s431_s3] sm:$0xff] }
   0x4   :  { %51 = vmatpush.msra.mxu0 %v32_v1  ;;  %v308_v7 = vld [vmem:[%s429_s1] sm:$0x3] }
   0x5   :  { %76 = vmatpush.msra.mxu1 %v73_v4  ;;  %v71_v8 = vld [vmem:[%s432_s4 + $0x60] sm:$0xff] }
   0x6   :  { %52 = vmatpush.msra.mxu0 %v31_v3 }
   0x7   :  { %77 = vmatpush.msra.mxu1 %v72_v5 }
   0x8   :  { %13 = vsyncpa [#allocation4], 0  ;;  %53 = vmatpush.msra.mxu0 %v30_v6  ;;  %v70_v9 = vld [vmem:[%s432_s4 + $0x58] sm:$0xff]  ;;  %v69_v10 = vld [vmem:[%s432_s4 + $0x50] sm:$0xff]  ;;  %vm95_vm1 = vcmask 1041408   ;;  %v162_v3 = vstv %s428_s0  ;;  %s243_s30 = smov [#allocation3]  }
   0x9   :  { %210 = vmatmul.msk.f32.vlgmr.msra.gmra.mxu0 %vm34_vm0, %v308_v7  ;;  %78 = vmatpush.msra.mxu1 %v71_v8  ;;  %v68_v11 = vld [vmem:[%s432_s4 + $0x48] sm:$0xff]  ;;  %v67_v12 = vld [vmem:[%s432_s4 + $0x40] sm:$0xff]  ;;  %v66_v13 = vld [vmem:[%s432_s4 + $0x38] sm:$0xff]  ;;  %s199_s8 = sshll.u32 %s243_s30, 4  ;;  %vm192_vm6 = vcmask 123904   ;;  %s200_s8 = int_to_ptr.vmem [resolvable:$true] %s199_s8 }
   0xa   :  { %v65_v14 = vld [vmem:[%s432_s4 + $0x30] sm:$0xff]  ;;  %v64_v15 = vld [vmem:[%s432_s4 + $0x28] sm:$0xff]  ;;  %v63_v16 = vld [vmem:[%s432_s4 + $0x20] sm:$0xff] }
   0xb   :  { %79 = vmatpush.msra.mxu1 %v70_v9  ;;  %v62_v17 = vld [vmem:[%s432_s4 + $0x18] sm:$0xff]  ;;  %v61_v18 = vld [vmem:[%s432_s4 + $0x10] sm:$0xff]  ;;  %v60_v19 = vld [vmem:[%s432_s4 + $0x8] sm:$0xff] }
   0xc   :  { %v59_v20 = vld [vmem:[%s432_s4] sm:$0xff]  ;;  %v137_v26 = vld [vmem:[%s433_s5 + $0x78] sm:$0xff]  ;;  %v136_v27 = vld [vmem:[%s433_s5 + $0x70] sm:$0xff] }
   0xd   :  { %80 = vmatpush.msra.mxu1 %v69_v10  ;;  %v354_v21 = vld [vmem:[%s430_s2] sm:$0x3]  ;;  %138 = vmatpush.msra.mxu2 %v137_v26  ;;  %v135_v28 = vld [vmem:[%s433_s5 + $0x68] sm:$0xff]  ;;  %v133_v35 = vld [vmem:[%s433_s5 + $0x58] sm:$0xff] }
   0xe   :  { %v134_v29 = vld [vmem:[%s433_s5 + $0x60] sm:$0xff]  ;;  %v132_v36 = vld [vmem:[%s433_s5 + $0x50] sm:$0xff]  ;;  %v131_v37 = vld [vmem:[%s433_s5 + $0x48] sm:$0xff] }
   0xf   :  { %81 = vmatpush.msra.mxu1 %v68_v11  ;;  %139 = vmatpush.msra.mxu2 %v136_v27  ;;  %v130_v38 = vld [vmem:[%s433_s5 + $0x40] sm:$0xff]  ;;  %v129_v39 = vld [vmem:[%s433_s5 + $0x38] sm:$0xff]  ;;  %v128_v40 = vld [vmem:[%s433_s5 + $0x30] sm:$0xff] }
  0x10   :  { %v127_v41 = vld [vmem:[%s433_s5 + $0x28] sm:$0xff]  ;;  %v126_v42 = vld [vmem:[%s433_s5 + $0x20] sm:$0xff]  ;;  %v125_v43 = vld [vmem:[%s433_s5 + $0x18] sm:$0xff] }
  0x11   :  { %82 = vmatpush.msra.mxu1 %v67_v12  ;;  %140 = vmatpush.msra.mxu2 %v135_v28  ;;  %v124_v44 = vld [vmem:[%s433_s5 + $0x10] sm:$0xff]  ;;  %v123_v45 = vld [vmem:[%s433_s5 + $0x8] sm:$0xff]  ;;  %v122_v46 = vld [vmem:[%s433_s5] sm:$0xff] }
  0x12   :  { %v168_v61 = vld [vmem:[%s434_s6 + $0x18] sm:$0xff]  ;;  %v167_v62 = vld [vmem:[%s434_s6 + $0x10] sm:$0xff]  ;;  %v166_v63 = vld [vmem:[%s434_s6 + $0x8] sm:$0xff] }
  0x13   :  { %83 = vmatpush.msra.mxu1 %v66_v13  ;;  %141 = vmatpush.msra.mxu2 %v134_v29  ;;  %v165_v0 = vld [vmem:[%s434_s6] sm:$0xff]  ;;  %s201_s6 = sshll.u32 %s435_s7, 4  ;;  %s202_s6 = int_to_ptr.hbm [resolvable:$true] %s201_s6 }
  0x14   :  { %184 = vmatpush.msra.mxu3 %v168_v61 }
  0x15   :  { %84 = vmatpush.msra.mxu1 %v65_v14  ;;  %142 = vmatpush.msra.mxu2 %v133_v35 }
  0x16   :  { %185 = vmatpush.msra.mxu3 %v167_v62 }
  0x17   :  { %85 = vmatpush.msra.mxu1 %v64_v15  ;;  %143 = vmatpush.msra.mxu2 %v132_v36 }
  0x18   :  { %186 = vmatpush.msra.mxu3 %v166_v63 }
  0x19   :  { %86 = vmatpush.msra.mxu1 %v63_v16  ;;  %144 = vmatpush.msra.mxu2 %v131_v37 }
  0x1a   :  { %187 = vmatpush.msra.mxu3 %v165_v0 }
  0x1b   :  { %87 = vmatpush.msra.mxu1 %v62_v17  ;;  %145 = vmatpush.msra.mxu2 %v130_v38 }
  0x1d   :  { %88 = vmatpush.msra.mxu1 %v61_v18  ;;  %146 = vmatpush.msra.mxu2 %v129_v39 }
  0x1f   :  { %89 = vmatpush.msra.mxu1 %v60_v19  ;;  %147 = vmatpush.msra.mxu2 %v128_v40 }
  0x21   :  { %90 = vmatpush.msra.mxu1 %v59_v20  ;;  %148 = vmatpush.msra.mxu2 %v127_v41 }
  0x23   :  { %149 = vmatpush.msra.mxu2 %v126_v42 }
  0x25   :  { %150 = vmatpush.msra.mxu2 %v125_v43 }
  0x27   :  { %151 = vmatpush.msra.mxu2 %v124_v44 }
  0x29   :  { %152 = vmatpush.msra.mxu2 %v123_v45 }
  0x2b   :  { %153 = vmatpush.msra.mxu2 %v122_v46 }
  0x86   :  { %v55_v22 = vpop.f32.mrf.mxu0 }
  0x87   :  { %v58_v23 = vmul.f32 %v55_v22, %v354_v21 }
  0x89   :  { %91 = vmatmul.f32.vlgmr.msra.gmra.mxu1 %v58_v23 }
 0x106   :  { %v92_v24 = vpop.f32.mrf.mxu1 }
 0x107   :  { %v96_v25 = vsel %vm95_vm1, %v92_v24, -inf }
 0x108   :  { %97 = vmax.xlane.f32.xlu0 %v96_v25 }
 0x17b   :  { %v98_v30 = vpop.xlane.xlu0 %97 }
 0x17c   :  { %v99_v31 = vsub.f32 %v92_v24, %v98_v30 }
 0x17e   :  { %v100_v32 = vmul.f32 1.442695, %v99_v31 }
 0x180   :  { %213 = vpow2.f32 %v100_v32 }
 0x186   :  { %v214_v33 = vpop.eup %213 }
 0x187   :  { %v102_v34 = vsel %vm95_vm1, %v214_v33, 0.0 }
 0x188   :  { %103 = vadd.xlane.f32.xlu0 %v102_v34 }
 0x1fb   :  { %v104_v47 = vpop.xlane.xlu0 %103 }
 0x1fc   :  { %215 = vrcp.f32 %v104_v47  ;;  %v116_v51 = vand.u32 2147483648, %v104_v47  ;;  %v114_v53 = vand.u32 2147483647, %v104_v47  ;;  %vm110_vm3 = vweird.f32 %v104_v47 }
 0x1fe   :  { %v117_v55 = vor.u32 1.1754944e-38, %v116_v51  ;;  %vm115_vm5 = vcmp.eq.f32.partialorder %v114_v53, 8.507059e+37 }
 0x202   :  { %v216_v48 = vpop.eup %215 }
 0x203   :  { %v106_v49 = vmul.f32 %v216_v48, %v104_v47  ;;  %vm111_vm2 = vweird.f32 %v216_v48 }
 0x204   :  { %vm112_vm4 = vmor %vm110_vm3, %vm111_vm2 }
 0x205   :  { %v107_v50 = vsub.f32 1.0, %v106_v49 }
 0x207   :  { %v108_v52 = vmul.f32 %v216_v48, %v107_v50 }
 0x209   :  { %v109_v54 = vadd.f32 %v216_v48, %v108_v52 }
 0x20b   :  { %v113_v56 = vsel %vm112_vm4, %v216_v48, %v109_v54 }
 0x20c   :  { %v118_v57 = vsel %vm115_vm5, %v117_v55, %v113_v56 }
 0x20d   :  { %v119_v58 = vmul.f32 32.0, %v118_v57 }
 0x20f   :  { %v120_v59 = vmul.f32 %v214_v33, %v119_v58 }
 0x211   :  { %v121_v60 = vmul.f32 %v120_v59, %v354_v21 }
 0x213   :  { %154 = vmatmul.f32.vlgmr.msra.gmra.mxu2 %v121_v60 }
 0x296   :  { %v155_v1 = vpop.f32.mrf.mxu2 }
 0x297   :  { %v158_v2 = vadd.f32 %v155_v1, %v308_v7 }
 0x299   :  { %v161_v4 = vmin.f32 %v158_v2, 0.0  ;;  %v160_v5 = vmax.f32 %v158_v2, 0.0 }
 0x29b   :  { %v163_v6 = vmul.f32 %v162_v3, %v161_v4 }
 0x29d   :  { %v164_v8 = vadd.f32 %v163_v6, %v160_v5 }
 0x29f   :  { %211 = vmatmul.msk.f32.vlgmr.msra.gmra.mxu3 %vm34_vm0, %v164_v8 }
 0x322   :  { %v189_v7 = vpop.f32.mrf.mxu3 }
 0x323   :  { %193 = vst.msk [vmem:[#allocation3] sm:$0x3] %vm192_vm6, %v189_v7 }
 0x324   :  { %204 = dma.vmem_to_hbm [thread:$0]  %s200_s8, 32, %s202_s6, [#allocation4]  }
 0x325   :  { %241 = dma.done.wait [#allocation4], 32  }
 0x326   :  { %242 = vsyncadd [#allocation4], 4294967264 }
 0x327   :  { %209 = vsyncpa [#allocation4], 1 }

</bundles_post_ra>
